<compile_context>
chip_gen: v6e
topology: v6e:2x2x1
jax: 0.10.0
libtpu: 0.0.40
codegen_flags: <defaults>
</compile_context>

<pallas_src>
import jax
import jax.numpy as jnp
import numpy as np
from jax.experimental import pallas as pl
from jax.experimental.pallas import tpu as pltpu


def _spherical_param_kernel(theta_ref, phi_ref, theta_out_ref, phi_out_ref):
    # forward(): return (theta, phi) unchanged — pure scalar pass-through in SMEM.
    theta_out_ref[0] = theta_ref[0]
    phi_out_ref[0] = phi_ref[0]


def _spherical_parameter_pallas(theta: jax.Array, phi: jax.Array):
    """Pallas equivalent of SphericalParameter.forward().

    Args:
      theta: shape (1,) float32 parameter (polar angle).
      phi:   shape (1,) float32 parameter (azimuth).

    Returns:
      (theta, phi) tuple, each shape (1,) float32, values unchanged.
    """
    return pl.pallas_call(
        _spherical_param_kernel,
        out_shape=(
            jax.ShapeDtypeStruct(theta.shape, theta.dtype),
            jax.ShapeDtypeStruct(phi.shape, phi.dtype),
        ),
        in_specs=[
            pl.BlockSpec(memory_space=pltpu.SMEM),
            pl.BlockSpec(memory_space=pltpu.SMEM),
        ],
        out_specs=(
            pl.BlockSpec(memory_space=pltpu.SMEM),
            pl.BlockSpec(memory_space=pltpu.SMEM),
        ),
        # Both outputs alias their corresponding inputs -> writeback is a no-op
        # at the buffer level (given donation at the jit boundary below).
        input_output_aliases={0: 0, 1: 1},
    )(theta, phi)


# jit + donation: one dispatch, and the input buffers are actually donatable so
# the input_output_aliases above are honored without a defensive copy.
spherical_parameter_forward = jax.jit(_spherical_parameter_pallas, donate_argnums=(0, 1))


if __name__ == "__main__":
    # Deterministic parameter init, mirroring
    #   SphericalParameter(optimized_params=[theta0, phi0])
    # i.e. theta = Parameter(tensor([theta0])), phi = Parameter(tensor([phi0])).
    key = jax.random.PRNGKey(0)
    k_theta, k_phi = jax.random.split(key)
    theta = jax.random.uniform(k_theta, (1,), dtype=jnp.float32) * jnp.pi        # polar angle
    phi = jax.random.uniform(k_phi, (1,), dtype=jnp.float32) * (2.0 * jnp.pi)    # azimuth

    # Host-side reference copies: theta/phi are DONATED to the jitted call, so
    # their device buffers are invalid afterwards; compare against these.
    theta_expected = np.asarray(theta)
    phi_expected = np.asarray(phi)

    out_theta, out_phi = spherical_parameter_forward(theta, phi)
    jax.block_until_ready((out_theta, out_phi))

    # Sanity check: forward() must return the parameters unchanged.
    assert out_theta.shape == (1,) and out_phi.shape == (1,)
    assert out_theta.dtype == jnp.float32 and out_phi.dtype == jnp.float32
    assert np.array_equal(np.asarray(out_theta), theta_expected)
    assert np.array_equal(np.asarray(out_phi), phi_expected)

    print("KERNEL_OK")
</pallas_src>

<mosaic_0001>
module attributes {stable_mosaic.version = 11 : i64} {
  func.func @_spherical_param_kernel(%arg0: memref<1xf32, #tpu.memory_space<smem>>, %arg1: memref<1xf32, #tpu.memory_space<smem>>, %arg2: memref<1xf32, #tpu.memory_space<smem>>, %arg3: memref<1xf32, #tpu.memory_space<smem>>) attributes {dimension_semantics = [], scalar_prefetch = 0 : i64, scratch_operands = 0 : i64, tpu.core_type = #tpu.core_type<tc>} {
    %c0 = arith.constant 0 : index
    %0 = memref.load %arg0[%c0] : memref<1xf32, #tpu.memory_space<smem>>
    %c0_0 = arith.constant 0 : index
    %1 = memref.load %arg2[%c0_0] : memref<1xf32, #tpu.memory_space<smem>>
    memref.store %0, %arg2[%c0_0] : memref<1xf32, #tpu.memory_space<smem>>
    %c0_1 = arith.constant 0 : index
    %2 = memref.load %arg1[%c0_1] : memref<1xf32, #tpu.memory_space<smem>>
    %c0_2 = arith.constant 0 : index
    %3 = memref.load %arg3[%c0_2] : memref<1xf32, #tpu.memory_space<smem>>
    memref.store %2, %arg3[%c0_2] : memref<1xf32, #tpu.memory_space<smem>>
    return
  }
}

</mosaic_0001>

<bundles_post_ra>
// kernel: _spherical_parameter_pallas.1
= control target key start
LH: loop header
LB: loop body
LE: loop exit
PB: predicated region body
PF: predicated region fallthrough
CT: control target
= control target key end

     0   :  { %11 = vsyncpa [#allocation5], 0  ;;  %s104_s0 = inlined_call_operand.<no memory space> [shape: f32[1], index: 0, kind: input, shape index: {}, may-alias: {0,2}]   ;;  %s105_s1 = inlined_call_operand.<no memory space> [shape: f32[1], index: 1, kind: input, shape index: {}, may-alias: {1,3}]   ;;  %s106_s2 = inlined_call_operand.hbm [shape: f32[1], index: 2, kind: output, shape index: {0}, may-alias: {0,2}]   ;;  %s107_s3 = inlined_call_operand.hbm [shape: f32[1], index: 3, kind: output, shape index: {1}, may-alias: {1,3}]  }
   0x1   :  { %19 = sst [smem:[#allocation4]] %s104_s0 }
   0x2   :  { %12 = vsyncpa [#allocation7], 0  ;;  %s70_s14 = smov [#allocation4]   ;;  %22 = sst [smem:[#allocation6]] %s105_s1 }
   0x3   :  { %30 = dma.smem_to_hbm %s70_s14, 16, %s106_s2, [#allocation5]  }
   0x4   :  { %s71_s19 = smov [#allocation6]  }
   0x5   :  { %38 = dma.smem_to_hbm %s71_s19, 16, %s107_s3, [#allocation7]  }
   0x6   :  { %66 = dma.done.wait [#allocation5], 16  }
   0x7   :  { %67 = vsyncadd [#allocation5], 4294967280 }
   0x8   :  { %68 = dma.done.wait [#allocation7], 16  }
   0x9   :  { %69 = vsyncadd [#allocation7], 4294967280 }
   0xa   :  { %45 = sfence }
   0xb   :  { %46 = vsyncpa [#allocation5], 1 }
   0xc   :  { %47 = vsyncpa [#allocation7], 1 }

</bundles_post_ra>
